<compile_context>
chip_gen: v5e
topology: v5e:2x2
jax: 0.10.0
libtpu: 0.0.40
codegen_flags: <defaults>
</compile_context>

<pallas_src>
import jax
import jax.numpy as jnp
from jax.experimental import pallas as pl
from jax.experimental.pallas import tpu as pltpu

N_FEATURES = 4
DIMS = [N_FEATURES, 50, 50, 50, 2, 50, 50, 50, N_FEATURES]  # 8 linear layers


def _round_up(n, m):
    return ((n + m - 1) // m) * m


def _make_ae_kernel(act_dtype, mxu_dtype, mxu_precision):
    """Builds the full-forward kernel for one (TB, 4) batch tile."""

    def kernel(x_ref,
               w1, b1, w2, b2, w3, b3, w4, b4,   # encoder
               w5, b5, w6, b6, w7, b7, w8, b8,   # decoder
               o_ref):
        def lin(h, w_r, b_r):
            # All layers on the MXU (it has large slack here); f32 accumulate,
            # bias add in f32. Weights are pre-cast to mxu_dtype in the wrapper.
            return jnp.dot(h.astype(mxu_dtype), w_r[...],
                           preferred_element_type=jnp.float32,
                           precision=mxu_precision) + b_r[...]

        def act(h):
            # tanh on the EUP; bf16 on v6e/v7x packs 2 elem/lane -> ~2x fewer
            # EUP pushes. On f32-only chips act_dtype == f32 (no-op cast).
            return jnp.tanh(h.astype(act_dtype))

        h = x_ref[...]
        # encode: en4(tanh(en3(tanh(en2(tanh(en1(x)))))))
        h = act(lin(h, w1, b1))          # en1  (TB, 50)
        h = act(lin(h, w2, b2))          # en2  (TB, 50)
        h = act(lin(h, w3, b3))          # en3  (TB, 50)
        z = lin(h, w4, b4)               # en4 latent (TB, 2), no tanh here
        # decode: de4(tanh(de3(tanh(de2(tanh(de1(tanh(z))))))))
        h = act(z)                       # decode() applies tanh to its input
        h = act(lin(h, w5, b5))          # de1  (TB, 50)
        h = act(lin(h, w6, b6))          # de2  (TB, 50)
        h = act(lin(h, w7, b7))          # de3  (TB, 50)
        out = lin(h, w8, b8)             # de4  (TB, 4), no activation
        o_ref[...] = out.astype(o_ref.dtype)

    return kernel


def init_params(key, dims=DIMS, dtype=jnp.float32):
    """PyTorch-style init: U(-1/sqrt(fan_in), 1/sqrt(fan_in)).

    Weights stored as (in, out) = PyTorch weight transposed; biases as (1, out).
    """
    params = []
    for i in range(len(dims) - 1):
        fan_in, fan_out = dims[i], dims[i + 1]
        key, kw, kb = jax.random.split(key, 3)
        bound = 1.0 / jnp.sqrt(jnp.array(fan_in, dtype))
        w = jax.random.uniform(kw, (fan_in, fan_out), dtype, -bound, bound)
        b = jax.random.uniform(kb, (1, fan_out), dtype, -bound, bound)
        params.append((w, b))
    return params


def _resolve_mode(mode):
    if mode != "auto":
        return mode
    kind = jax.devices()[0].device_kind.lower()
    if ("v6" in kind) or ("v7" in kind) or ("7x" in kind):
        return "bf16"       # bf16-native EUP/VPU/MXU
    if ("v5e" in kind) or ("v5 lite" in kind) or ("v5litepod" in kind):
        return "bf16_mxu"   # bf16 MXU only; VPU/EUP are f32-only on v5e
    return "f32"            # v4 / v5p / unknown: exact path


def ae_2d_v50_forward(x, params, *, block_rows=2048, mode="auto"):
    """x: (batch, n_features) float32 -> (batch, n_features) float32."""
    batch, nf = x.shape
    assert nf == N_FEATURES

    mode = _resolve_mode(mode)
    assert mode in ("f32", "bf16_mxu", "bf16"), mode
    act_dtype = jnp.bfloat16 if mode == "bf16" else jnp.float32
    mxu_dtype = jnp.bfloat16 if mode in ("bf16", "bf16_mxu") else jnp.float32
    # Explicit MXU precision on the f32 path (no silent reduced-precision pass);
    # bf16 inputs take the single-pass default.
    mxu_precision = (jax.lax.Precision.HIGHEST
                     if mxu_dtype == jnp.float32 else None)

    # Batch tile: big tiles amortize the per-grid-step overhead and give the
    # scheduler one long basic block; shrink (8-aligned) for tiny batches.
    tb = min(block_rows, _round_up(batch, 8))
    if _round_up(batch, tb) // tb < 2 and batch > 8:
        # Prefer >= 2 grid steps so v7x's two TensorCores both get a tile
        # (one extra cheap grid step on single-TC chips).
        tb = _round_up(pl.cdiv(batch, 2), 8)
    padded = _round_up(batch, tb)
    if padded != batch:
        x = jnp.pad(x, ((0, padded - batch), (0, 0)))
    n_blocks = padded // tb

    flat_params = []
    in_specs = [pl.BlockSpec((tb, N_FEATURES), lambda i: (i, 0))]
    for w, b in params:
        # Weights pre-cast to the MXU input dtype; biases stay f32 (f32 add).
        flat_params.append(w.astype(mxu_dtype))
        flat_params.append(b.astype(jnp.float32))
        # Full-array blocks with constant index_maps: weights/biases stay
        # VMEM-resident across all grid iterations (no per-step re-DMA).
        in_specs.append(pl.BlockSpec(w.shape, lambda i: (0, 0)))
        in_specs.append(pl.BlockSpec(b.shape, lambda i: (0, 0)))

    kernel = _make_ae_kernel(act_dtype, mxu_dtype, mxu_precision)

    out = pl.pallas_call(
        kernel,
        out_shape=jax.ShapeDtypeStruct((padded, N_FEATURES), jnp.float32),
        grid=(n_blocks,),
        in_specs=in_specs,
        out_specs=pl.BlockSpec((tb, N_FEATURES), lambda i: (i, 0)),
        compiler_params=pltpu.CompilerParams(
            dimension_semantics=("parallel",),
            # Generous but safe on every chip (v7x physical VMEM is 64 MiB);
            # actual usage at TB=2048 is only a few MiB.
            vmem_limit_bytes=32 * 1024 * 1024),
    )(x, *flat_params)

    return out[:batch]


def ae_2d_v50_reference(x, params):
    """Pure-JAX reference for correctness checking."""
    def lin(h, wb):
        w, b = wb
        return h @ w + b

    h = jnp.tanh(lin(x, params[0]))
    h = jnp.tanh(lin(h, params[1]))
    h = jnp.tanh(lin(h, params[2]))
    z = lin(h, params[3])
    h = jnp.tanh(z)
    h = jnp.tanh(lin(h, params[4]))
    h = jnp.tanh(lin(h, params[5]))
    h = jnp.tanh(lin(h, params[6]))
    return lin(h, params[7])


if __name__ == "__main__":
    key = jax.random.PRNGKey(0)
    key, kx1, kx2 = jax.random.split(key, 3)
    params = init_params(key)

    # Exact-precision path (f32 MXU, Precision.HIGHEST) — single tile.
    x_small = jax.random.normal(kx1, (8, N_FEATURES), jnp.float32)
    out_small = jax.block_until_ready(
        ae_2d_v50_forward(x_small, params, mode="f32"))
    ref_small = ae_2d_v50_reference(x_small, params)
    assert out_small.shape == x_small.shape
    assert jnp.allclose(out_small, ref_small, atol=1e-5, rtol=1e-5), \
        "mismatch vs reference (batch=8, f32)"

    # Exact-precision path — exercises the multi-tile batch grid + padding
    # (600 rows -> two 304-row tiles, 8 padded rows).
    x_big = jax.random.normal(kx2, (600, N_FEATURES), jnp.float32)
    out_big = jax.block_until_ready(
        ae_2d_v50_forward(x_big, params, mode="f32"))
    ref_big = ae_2d_v50_reference(x_big, params)
    assert out_big.shape == x_big.shape
    assert jnp.allclose(out_big, ref_big, atol=1e-5, rtol=1e-5), \
        "mismatch vs reference (batch=600, tiled, f32)"

    # Chip-tuned fast path (bf16 tanh/MXU on v6e/v7x, bf16 MXU-only on v5e,
    # f32 elsewhere). Gated behind mode= and checked with a relaxed tolerance
    # since bf16 changes numerics vs. the PyTorch f32 reference.
    out_fast = jax.block_until_ready(
        ae_2d_v50_forward(x_big, params, mode="auto"))
    assert out_fast.shape == x_big.shape
    assert jnp.allclose(out_fast, ref_big, atol=1e-1, rtol=1e-1), \
        "mismatch vs reference (batch=600, chip-tuned fast path)"

    print("KERNEL_OK")
</pallas_src>

<mosaic_0001>
module attributes {stable_mosaic.version = 11 : i64} {
  func.func @kernel(%arg0: i32, %arg1: memref<8x4xf32, #tpu.memory_space<vmem>>, %arg2: memref<4x50xf32, #tpu.memory_space<vmem>>, %arg3: memref<1x50xf32, #tpu.memory_space<vmem>>, %arg4: memref<50x50xf32, #tpu.memory_space<vmem>>, %arg5: memref<1x50xf32, #tpu.memory_space<vmem>>, %arg6: memref<50x50xf32, #tpu.memory_space<vmem>>, %arg7: memref<1x50xf32, #tpu.memory_space<vmem>>, %arg8: memref<50x2xf32, #tpu.memory_space<vmem>>, %arg9: memref<1x2xf32, #tpu.memory_space<vmem>>, %arg10: memref<2x50xf32, #tpu.memory_space<vmem>>, %arg11: memref<1x50xf32, #tpu.memory_space<vmem>>, %arg12: memref<50x50xf32, #tpu.memory_space<vmem>>, %arg13: memref<1x50xf32, #tpu.memory_space<vmem>>, %arg14: memref<50x50xf32, #tpu.memory_space<vmem>>, %arg15: memref<1x50xf32, #tpu.memory_space<vmem>>, %arg16: memref<50x4xf32, #tpu.memory_space<vmem>>, %arg17: memref<1x4xf32, #tpu.memory_space<vmem>>, %arg18: memref<8x4xf32, #tpu.memory_space<vmem>>) attributes {dimension_semantics = [#tpu.dimension_semantics<parallel>], iteration_bounds = array<i64: 1>, scalar_prefetch = 0 : i64, scratch_operands = 0 : i64, tpu.core_type = #tpu.core_type<tc>, window_params = [{transform_indices = @transform_0, window_bounds = array<i64: 8, 4>}, {pipeline_mode = #tpu.pipeline_mode<synchronous>, transform_indices = @transform_1, window_bounds = array<i64: 4, 50>}, {pipeline_mode = #tpu.pipeline_mode<synchronous>, transform_indices = @transform_2, window_bounds = array<i64: 1, 50>}, {pipeline_mode = #tpu.pipeline_mode<synchronous>, transform_indices = @transform_3, window_bounds = array<i64: 50, 50>}, {pipeline_mode = #tpu.pipeline_mode<synchronous>, transform_indices = @transform_4, window_bounds = array<i64: 1, 50>}, {pipeline_mode = #tpu.pipeline_mode<synchronous>, transform_indices = @transform_5, window_bounds = array<i64: 50, 50>}, {pipeline_mode = #tpu.pipeline_mode<synchronous>, transform_indices = @transform_6, window_bounds = array<i64: 1, 50>}, {pipeline_mode = #tpu.pipeline_mode<synchronous>, transform_indices = @transform_7, window_bounds = array<i64: 50, 2>}, {pipeline_mode = #tpu.pipeline_mode<synchronous>, transform_indices = @transform_8, window_bounds = array<i64: 1, 2>}, {pipeline_mode = #tpu.pipeline_mode<synchronous>, transform_indices = @transform_9, window_bounds = array<i64: 2, 50>}, {pipeline_mode = #tpu.pipeline_mode<synchronous>, transform_indices = @transform_10, window_bounds = array<i64: 1, 50>}, {pipeline_mode = #tpu.pipeline_mode<synchronous>, transform_indices = @transform_11, window_bounds = array<i64: 50, 50>}, {pipeline_mode = #tpu.pipeline_mode<synchronous>, transform_indices = @transform_12, window_bounds = array<i64: 1, 50>}, {pipeline_mode = #tpu.pipeline_mode<synchronous>, transform_indices = @transform_13, window_bounds = array<i64: 50, 50>}, {pipeline_mode = #tpu.pipeline_mode<synchronous>, transform_indices = @transform_14, window_bounds = array<i64: 1, 50>}, {pipeline_mode = #tpu.pipeline_mode<synchronous>, transform_indices = @transform_15, window_bounds = array<i64: 50, 4>}, {pipeline_mode = #tpu.pipeline_mode<synchronous>, transform_indices = @transform_16, window_bounds = array<i64: 1, 4>}, {transform_indices = @transform_17, window_bounds = array<i64: 8, 4>}]} {
    %c0 = arith.constant 0 : index
    %c0_0 = arith.constant 0 : index
    %0 = vector.load %arg1[%c0, %c0_0] : memref<8x4xf32, #tpu.memory_space<vmem>>, vector<8x4xf32>
    %c0_1 = arith.constant 0 : index
    %c0_2 = arith.constant 0 : index
    %1 = vector.load %arg2[%c0_1, %c0_2] : memref<4x50xf32, #tpu.memory_space<vmem>>, vector<4x50xf32>
    %cst = arith.constant dense<0.000000e+00> : vector<8x50xf32>
    %2 = tpu.matmul %0, %1, %cst {dimension_numbers = #tpu.dot_dimension_numbers<[1], [0], [0], [1], [0, 0, 1, 1], [], []>, precision = #tpu.contract_precision<fp32>} : vector<8x4xf32>, vector<4x50xf32>, vector<8x50xf32> -> vector<8x50xf32>
    %c0_3 = arith.constant 0 : index
    %c0_4 = arith.constant 0 : index
    %3 = vector.load %arg3[%c0_3, %c0_4] : memref<1x50xf32, #tpu.memory_space<vmem>>, vector<1x50xf32>
    %4 = vector.broadcast %3 : vector<1x50xf32> to vector<8x50xf32>
    %5 = arith.addf %2, %4 : vector<8x50xf32>
    %6 = math.tanh %5 : vector<8x50xf32>
    %c0_5 = arith.constant 0 : index
    %c0_6 = arith.constant 0 : index
    %7 = vector.load %arg4[%c0_5, %c0_6] : memref<50x50xf32, #tpu.memory_space<vmem>>, vector<50x50xf32>
    %cst_7 = arith.constant dense<0.000000e+00> : vector<8x50xf32>
    %8 = tpu.matmul %6, %7, %cst_7 {dimension_numbers = #tpu.dot_dimension_numbers<[1], [0], [0], [1], [0, 0, 1, 1], [], []>, precision = #tpu.contract_precision<fp32>} : vector<8x50xf32>, vector<50x50xf32>, vector<8x50xf32> -> vector<8x50xf32>
    %c0_8 = arith.constant 0 : index
    %c0_9 = arith.constant 0 : index
    %9 = vector.load %arg5[%c0_8, %c0_9] : memref<1x50xf32, #tpu.memory_space<vmem>>, vector<1x50xf32>
    %10 = vector.broadcast %9 : vector<1x50xf32> to vector<8x50xf32>
    %11 = arith.addf %8, %10 : vector<8x50xf32>
    %12 = math.tanh %11 : vector<8x50xf32>
    %c0_10 = arith.constant 0 : index
    %c0_11 = arith.constant 0 : index
    %13 = vector.load %arg6[%c0_10, %c0_11] : memref<50x50xf32, #tpu.memory_space<vmem>>, vector<50x50xf32>
    %cst_12 = arith.constant dense<0.000000e+00> : vector<8x50xf32>
    %14 = tpu.matmul %12, %13, %cst_12 {dimension_numbers = #tpu.dot_dimension_numbers<[1], [0], [0], [1], [0, 0, 1, 1], [], []>, precision = #tpu.contract_precision<fp32>} : vector<8x50xf32>, vector<50x50xf32>, vector<8x50xf32> -> vector<8x50xf32>
    %c0_13 = arith.constant 0 : index
    %c0_14 = arith.constant 0 : index
    %15 = vector.load %arg7[%c0_13, %c0_14] : memref<1x50xf32, #tpu.memory_space<vmem>>, vector<1x50xf32>
    %16 = vector.broadcast %15 : vector<1x50xf32> to vector<8x50xf32>
    %17 = arith.addf %14, %16 : vector<8x50xf32>
    %18 = math.tanh %17 : vector<8x50xf32>
    %c0_15 = arith.constant 0 : index
    %c0_16 = arith.constant 0 : index
    %19 = vector.load %arg8[%c0_15, %c0_16] : memref<50x2xf32, #tpu.memory_space<vmem>>, vector<50x2xf32>
    %cst_17 = arith.constant dense<0.000000e+00> : vector<8x2xf32>
    %20 = tpu.matmul %18, %19, %cst_17 {dimension_numbers = #tpu.dot_dimension_numbers<[1], [0], [0], [1], [0, 0, 1, 1], [], []>, precision = #tpu.contract_precision<fp32>} : vector<8x50xf32>, vector<50x2xf32>, vector<8x2xf32> -> vector<8x2xf32>
    %c0_18 = arith.constant 0 : index
    %c0_19 = arith.constant 0 : index
    %21 = vector.load %arg9[%c0_18, %c0_19] : memref<1x2xf32, #tpu.memory_space<vmem>>, vector<1x2xf32>
    %22 = vector.broadcast %21 : vector<1x2xf32> to vector<8x2xf32>
    %23 = arith.addf %20, %22 : vector<8x2xf32>
    %24 = math.tanh %23 : vector<8x2xf32>
    %c0_20 = arith.constant 0 : index
    %c0_21 = arith.constant 0 : index
    %25 = vector.load %arg10[%c0_20, %c0_21] : memref<2x50xf32, #tpu.memory_space<vmem>>, vector<2x50xf32>
    %cst_22 = arith.constant dense<0.000000e+00> : vector<8x50xf32>
    %26 = tpu.matmul %24, %25, %cst_22 {dimension_numbers = #tpu.dot_dimension_numbers<[1], [0], [0], [1], [0, 0, 1, 1], [], []>, precision = #tpu.contract_precision<fp32>} : vector<8x2xf32>, vector<2x50xf32>, vector<8x50xf32> -> vector<8x50xf32>
    %c0_23 = arith.constant 0 : index
    %c0_24 = arith.constant 0 : index
    %27 = vector.load %arg11[%c0_23, %c0_24] : memref<1x50xf32, #tpu.memory_space<vmem>>, vector<1x50xf32>
    %28 = vector.broadcast %27 : vector<1x50xf32> to vector<8x50xf32>
    %29 = arith.addf %26, %28 : vector<8x50xf32>
    %30 = math.tanh %29 : vector<8x50xf32>
    %c0_25 = arith.constant 0 : index
    %c0_26 = arith.constant 0 : index
    %31 = vector.load %arg12[%c0_25, %c0_26] : memref<50x50xf32, #tpu.memory_space<vmem>>, vector<50x50xf32>
    %cst_27 = arith.constant dense<0.000000e+00> : vector<8x50xf32>
    %32 = tpu.matmul %30, %31, %cst_27 {dimension_numbers = #tpu.dot_dimension_numbers<[1], [0], [0], [1], [0, 0, 1, 1], [], []>, precision = #tpu.contract_precision<fp32>} : vector<8x50xf32>, vector<50x50xf32>, vector<8x50xf32> -> vector<8x50xf32>
    %c0_28 = arith.constant 0 : index
    %c0_29 = arith.constant 0 : index
    %33 = vector.load %arg13[%c0_28, %c0_29] : memref<1x50xf32, #tpu.memory_space<vmem>>, vector<1x50xf32>
    %34 = vector.broadcast %33 : vector<1x50xf32> to vector<8x50xf32>
    %35 = arith.addf %32, %34 : vector<8x50xf32>
    %36 = math.tanh %35 : vector<8x50xf32>
    %c0_30 = arith.constant 0 : index
    %c0_31 = arith.constant 0 : index
    %37 = vector.load %arg14[%c0_30, %c0_31] : memref<50x50xf32, #tpu.memory_space<vmem>>, vector<50x50xf32>
    %cst_32 = arith.constant dense<0.000000e+00> : vector<8x50xf32>
    %38 = tpu.matmul %36, %37, %cst_32 {dimension_numbers = #tpu.dot_dimension_numbers<[1], [0], [0], [1], [0, 0, 1, 1], [], []>, precision = #tpu.contract_precision<fp32>} : vector<8x50xf32>, vector<50x50xf32>, vector<8x50xf32> -> vector<8x50xf32>
    %c0_33 = arith.constant 0 : index
    %c0_34 = arith.constant 0 : index
    %39 = vector.load %arg15[%c0_33, %c0_34] : memref<1x50xf32, #tpu.memory_space<vmem>>, vector<1x50xf32>
    %40 = vector.broadcast %39 : vector<1x50xf32> to vector<8x50xf32>
    %41 = arith.addf %38, %40 : vector<8x50xf32>
    %42 = math.tanh %41 : vector<8x50xf32>
    %c0_35 = arith.constant 0 : index
    %c0_36 = arith.constant 0 : index
    %43 = vector.load %arg16[%c0_35, %c0_36] : memref<50x4xf32, #tpu.memory_space<vmem>>, vector<50x4xf32>
    %cst_37 = arith.constant dense<0.000000e+00> : vector<8x4xf32>
    %44 = tpu.matmul %42, %43, %cst_37 {dimension_numbers = #tpu.dot_dimension_numbers<[1], [0], [0], [1], [0, 0, 1, 1], [], []>, precision = #tpu.contract_precision<fp32>} : vector<8x50xf32>, vector<50x4xf32>, vector<8x4xf32> -> vector<8x4xf32>
    %c0_38 = arith.constant 0 : index
    %c0_39 = arith.constant 0 : index
    %45 = vector.load %arg17[%c0_38, %c0_39] : memref<1x4xf32, #tpu.memory_space<vmem>>, vector<1x4xf32>
    %46 = vector.broadcast %45 : vector<1x4xf32> to vector<8x4xf32>
    %47 = arith.addf %44, %46 : vector<8x4xf32>
    %c0_40 = arith.constant 0 : index
    %c0_41 = arith.constant 0 : index
    %48 = vector.load %arg18[%c0_40, %c0_41] : memref<8x4xf32, #tpu.memory_space<vmem>>, vector<8x4xf32>
    tpu.vector_store %arg18[%c0_40, %c0_41], %47 {strides = array<i32>} : memref<8x4xf32, #tpu.memory_space<vmem>>, vector<8x4xf32>,
    return
  }
  func.func @transform_0(%arg0: i32) -> (i32, i32) {
    %c0_i32 = arith.constant 0 : i32
    %c0_i32_0 = arith.constant 0 : i32
    return %arg0, %c0_i32 : i32, i32
  }
  func.func @transform_1(%arg0: i32) -> (i32, i32) {
    %c0_i32 = arith.constant 0 : i32
    %c0_i32_0 = arith.constant 0 : i32
    %c0_i32_1 = arith.constant 0 : i32
    return %c0_i32, %c0_i32_0 : i32, i32
  }
  func.func @transform_2(%arg0: i32) -> (i32, i32) {
    %c0_i32 = arith.constant 0 : i32
    %c0_i32_0 = arith.constant 0 : i32
    %c0_i32_1 = arith.constant 0 : i32
    return %c0_i32, %c0_i32_0 : i32, i32
  }
  func.func @transform_3(%arg0: i32) -> (i32, i32) {
    %c0_i32 = arith.constant 0 : i32
    %c0_i32_0 = arith.constant 0 : i32
    %c0_i32_1 = arith.constant 0 : i32
    return %c0_i32, %c0_i32_0 : i32, i32
  }
  func.func @transform_4(%arg0: i32) -> (i32, i32) {
    %c0_i32 = arith.constant 0 : i32
    %c0_i32_0 = arith.constant 0 : i32
    %c0_i32_1 = arith.constant 0 : i32
    return %c0_i32, %c0_i32_0 : i32, i32
  }
  func.func @transform_5(%arg0: i32) -> (i32, i32) {
    %c0_i32 = arith.constant 0 : i32
    %c0_i32_0 = arith.constant 0 : i32
    %c0_i32_1 = arith.constant 0 : i32
    return %c0_i32, %c0_i32_0 : i32, i32
  }
  func.func @transform_6(%arg0: i32) -> (i32, i32) {
    %c0_i32 = arith.constant 0 : i32
    %c0_i32_0 = arith.constant 0 : i32
    %c0_i32_1 = arith.constant 0 : i32
    return %c0_i32, %c0_i32_0 : i32, i32
  }
  func.func @transform_7(%arg0: i32) -> (i32, i32) {
    %c0_i32 = arith.constant 0 : i32
    %c0_i32_0 = arith.constant 0 : i32
    %c0_i32_1 = arith.constant 0 : i32
    return %c0_i32, %c0_i32_0 : i32, i32
  }
  func.func @transform_8(%arg0: i32) -> (i32, i32) {
    %c0_i32 = arith.constant 0 : i32
    %c0_i32_0 = arith.constant 0 : i32
    %c0_i32_1 = arith.constant 0 : i32
    return %c0_i32, %c0_i32_0 : i32, i32
  }
  func.func @transform_9(%arg0: i32) -> (i32, i32) {
    %c0_i32 = arith.constant 0 : i32
    %c0_i32_0 = arith.constant 0 : i32
    %c0_i32_1 = arith.constant 0 : i32
    return %c0_i32, %c0_i32_0 : i32, i32
  }
  func.func @transform_10(%arg0: i32) -> (i32, i32) {
    %c0_i32 = arith.constant 0 : i32
    %c0_i32_0 = arith.constant 0 : i32
    %c0_i32_1 = arith.constant 0 : i32
    return %c0_i32, %c0_i32_0 : i32, i32
  }
  func.func @transform_11(%arg0: i32) -> (i32, i32) {
    %c0_i32 = arith.constant 0 : i32
    %c0_i32_0 = arith.constant 0 : i32
    %c0_i32_1 = arith.constant 0 : i32
    return %c0_i32, %c0_i32_0 : i32, i32
  }
  func.func @transform_12(%arg0: i32) -> (i32, i32) {
    %c0_i32 = arith.constant 0 : i32
    %c0_i32_0 = arith.constant 0 : i32
    %c0_i32_1 = arith.constant 0 : i32
    return %c0_i32, %c0_i32_0 : i32, i32
  }
  func.func @transform_13(%arg0: i32) -> (i32, i32) {
    %c0_i32 = arith.constant 0 : i32
    %c0_i32_0 = arith.constant 0 : i32
    %c0_i32_1 = arith.constant 0 : i32
    return %c0_i32, %c0_i32_0 : i32, i32
  }
  func.func @transform_14(%arg0: i32) -> (i32, i32) {
    %c0_i32 = arith.constant 0 : i32
    %c0_i32_0 = arith.constant 0 : i32
    %c0_i32_1 = arith.constant 0 : i32
    return %c0_i32, %c0_i32_0 : i32, i32
  }
  func.func @transform_15(%arg0: i32) -> (i32, i32) {
    %c0_i32 = arith.constant 0 : i32
    %c0_i32_0 = arith.constant 0 : i32
    %c0_i32_1 = arith.constant 0 : i32
    return %c0_i32, %c0_i32_0 : i32, i32
  }
  func.func @transform_16(%arg0: i32) -> (i32, i32) {
    %c0_i32 = arith.constant 0 : i32
    %c0_i32_0 = arith.constant 0 : i32
    %c0_i32_1 = arith.constant 0 : i32
    return %c0_i32, %c0_i32_0 : i32, i32
  }
  func.func @transform_17(%arg0: i32) -> (i32, i32) {
    %c0_i32 = arith.constant 0 : i32
    %c0_i32_0 = arith.constant 0 : i32
    return %arg0, %c0_i32 : i32, i32
  }
}

</mosaic_0001>

<bundles_post_ra>
// kernel: tpu_custom_call.1
= control target key start
LH: loop header
LB: loop body
LE: loop exit
PB: predicated region body
PF: predicated region fallthrough
CT: control target
= control target key end

     0   :  { %s2295_s0 = inlined_call_operand.vmem [shape: f32[8,4], index: 0, kind: input, shape index: {}]   ;;  %s2296_s1 = inlined_call_operand.vmem [shape: f32[4,50], index: 1, kind: input, shape index: {}]   ;;  %s2297_s2 = inlined_call_operand.vmem [shape: f32[1,50], index: 2, kind: input, shape index: {}]   ;;  %s2298_s3 = inlined_call_operand.vmem [shape: f32[50,50], index: 3, kind: input, shape index: {}]   ;;  %s2299_s4 = inlined_call_operand.vmem [shape: f32[1,50], index: 4, kind: input, shape index: {}]   ;;  %s2300_s5 = inlined_call_operand.vmem [shape: f32[50,50], index: 5, kind: input, shape index: {}]   ;;  %s2301_s6 = inlined_call_operand.vmem [shape: f32[1,50], index: 6, kind: input, shape index: {}]   ;;  %s2302_s7 = inlined_call_operand.vmem [shape: f32[50,2], index: 7, kind: input, shape index: {}]   ;;  %s2303_s8 = inlined_call_operand.vmem [shape: f32[1,2], index: 8, kind: input, shape index: {}]   ;;  %s2304_s9 = inlined_call_operand.vmem [shape: f32[2,50], index: 9, kind: input, shape index: {}]   ;;  %s2305_s10 = inlined_call_operand.vmem [shape: f32[1,50], index: 10, kind: input, shape index: {}]   ;;  %s2306_s11 = inlined_call_operand.hbm [shape: f32[50,50], index: 11, kind: input, shape index: {}]   ;;  %s2307_s12 = inlined_call_operand.vmem [shape: f32[1,50], index: 12, kind: input, shape index: {}]   ;;  %s2308_s13 = inlined_call_operand.hbm [shape: f32[50,50], index: 13, kind: input, shape index: {}]   ;;  %s2309_s14 = inlined_call_operand.vmem [shape: f32[1,50], index: 14, kind: input, shape index: {}]   ;;  %s2310_s15 = inlined_call_operand.vmem [shape: f32[50,4], index: 15, kind: input, shape index: {}]   ;;  %s2311_s16 = inlined_call_operand.vmem [shape: f32[1,4], index: 16, kind: input, shape index: {}]   ;;  %s2312_s17 = inlined_call_operand.vmem [shape: f32[8,4], index: 17, kind: output, shape index: {}]  }
   0x1   :  { %2313 = sst [smem:[#allocation8_spill]] %s2295_s0 }
   0x2   :  { %2314 = sst [smem:[#allocation9_spill]] %s2296_s1 }
   0x3   :  { %22 = vsyncpa [#allocation3], 0  ;;  %s50_s26 = sshll.u32 %s2306_s11, 4  ;;  %s51_s26 = int_to_ptr.hbm [resolvable:$true] %s50_s26 }
   0x4   :  { %23 = vsyncpa [#allocation5], 0  ;;  %s1946_s27 = smov [#allocation2]   ;;  %s65_s30 = sshll.u32 %s2308_s13, 4  ;;  %s66_s30 = int_to_ptr.hbm [resolvable:$true] %s65_s30 }
   0x5   :  { %s52_s28 = sshll.u32 %s1946_s27, 4  ;;  %s1947_s18 = smov 128   ;;  %s53_s28 = int_to_ptr.vmem [resolvable:$true] %s52_s28 }
   0x6   :  { %s1948_s19 = smov 8   ;;  %s1949_s1 = smov [#allocation4]  }
   0x7   :  { %58 = dma.hbm_to_vmem [thread:$0]  %s51_s26, 896, %s53_s28, [#allocation3], %s1947_s18, %s1947_s18, %s1948_s19  }
   0x8   :  { %s67_s20 = sshll.u32 %s1949_s1, 4  ;;  %s68_s20 = int_to_ptr.vmem [resolvable:$true] %s67_s20 }
   0x9   :  { %73 = dma.hbm_to_vmem [thread:$0]  %s66_s30, 896, %s68_s20, [#allocation5], %s1947_s18, %s1947_s18, %s1948_s19  }
   0xa   :  { %1942 = dma.done.wait [#allocation3], 896  }
   0xb   :  { %1943 = vsyncadd [#allocation3], 4294966400 }
   0xc   :  { %1944 = dma.done.wait [#allocation5], 896  }
   0xd   :  { %1945 = vsyncadd [#allocation5], 4294966400  ;;  %vm98_vm0 = vcmask 1043456   ;;  %vm94_vm1 = vcmask 31744   ;;  %s2315_s22 = sld [smem:[#allocation9_spill]]  ;;  %vm264_vm2 = vcmask 1041408  }
   0xe   :  { %s2316_s24 = sld [smem:[#allocation8_spill]]  ;;  %v255_v14 = vld [vmem:[%s2298_s3 + $0x30] sm:$0x3]  ;;  %v254_v17 = vld [vmem:[%s2298_s3 + $0x28] sm:$0xff]  ;;  %v253_v20 = vld [vmem:[%s2298_s3 + $0x20] sm:$0xff]  ;;  %vm260_vm3 = vcmask 408576  }
   0xf   :  { %v266_v15 = vsel %vm264_vm2, %v255_v14, 0  ;;  %v2063_v19 = vand.u32 4294901760, %v254_v17  ;;  %v2071_v23 = vand.u32 4294901760, %v253_v20  ;;  %v252_v24 = vld [vmem:[%s2298_s3 + $0x18] sm:$0xff]  ;;  %v251_v29 = vld [vmem:[%s2298_s3 + $0x10] sm:$0xff]  ;;  %v250_v35 = vld [vmem:[%s2298_s3 + $0x8] sm:$0xff] }
  0x10   :  { %v2057_v16 = vand.u32 4294901760, %v266_v15  ;;  %v283_v28 = vand.u32 4294901760, %v252_v24  ;;  %v285_v34 = vand.u32 4294901760, %v251_v29  ;;  %v287_v39 = vand.u32 4294901760, %v250_v35  ;;  %v249_v41 = vld [vmem:[%s2298_s3] sm:$0xff] }
  0x11   :  { %v316_v22 = vsub.f32 %v254_v17, %v2063_v19  ;;  %v322_v27 = vsub.f32 %v253_v20, %v2071_v23  ;;  %v289_v45 = vand.u32 4294901760, %v249_v41  ;;  %v1872_v57 = vld [vmem:[%s2297_s2] ss:$0 sm:$0xff]  ;;  %vm982_vm4 = vcmask 15360  }
  0x12   :  { %v310_v18 = vsub.f32 %v266_v15, %v2057_v16  ;;  %v328_v33 = vsub.f32 %v252_v24, %v283_v28  ;;  %v334_v40 = vsub.f32 %v251_v29, %v285_v34  ;;  %v340_v44 = vsub.f32 %v250_v35, %v287_v39 }
  0x13   :  { %v89_v0 = vld [vmem:[%s2315_s22] sm:$0xf]  ;;  %v317_v26 = vand.u32 4294901760, %v316_v22  ;;  %v323_v32 = vand.u32 4294901760, %v322_v27  ;;  %v346_v49 = vsub.f32 %v249_v41, %v289_v45 }
  0x14   :  { %v88_v1 = vld [vmem:[%s2316_s24] sm:$0xff]  ;;  %v100_v2 = vsel %vm98_vm0, %v89_v0, 0  ;;  %v311_v21 = vand.u32 4294901760, %v310_v18  ;;  %v329_v38 = vand.u32 4294901760, %v328_v33  ;;  %v335_v46 = vand.u32 4294901760, %v334_v40 }
  0x15   :  { %v96_v3 = vsel %vm94_vm1, %v88_v1, 0  ;;  %v117_v4 = vand.u32 4294901760, %v100_v2  ;;  %v318_v31 = vsub.f32 %v316_v22, %v317_v26  ;;  %v324_v37 = vsub.f32 %v322_v27, %v323_v32 }
  0x16   :  { %v119_v5 = vand.u32 4294901760, %v96_v3  ;;  %v312_v25 = vsub.f32 %v310_v18, %v311_v21  ;;  %v330_v43 = vsub.f32 %v328_v33, %v329_v38  ;;  %v341_v48 = vand.u32 4294901760, %v340_v44 }
  0x17   :  { %v144_v6 = vsub.f32 %v100_v2, %v117_v4  ;;  %118 = vmatpush.msra.mxu0 %v117_v4  ;;  %194 = vmatpush.msra.mxu3 %v117_v4  ;;  %v319_v36 = vand.u32 4294901760, %v318_v31  ;;  %v325_v42 = vand.u32 4294901760, %v324_v37  ;;  %v336_v50 = vsub.f32 %v334_v40, %v335_v46 }
  0x18   :  { %v120_v7 = vsub.f32 %v96_v3, %v119_v5  ;;  %v313_v30 = vand.u32 4294901760, %v312_v25  ;;  %v331_v47 = vand.u32 4294901760, %v330_v43  ;;  %v342_v51 = vsub.f32 %v340_v44, %v341_v48 }
  0x19   :  { %171 = vmatpush.msra.mxu2 %v144_v6  ;;  %v145_v9 = vand.u32 4294901760, %v144_v6  ;;  %v347_v52 = vand.u32 4294901760, %v346_v49  ;;  %v337_v53 = vand.u32 4294901760, %v336_v50 }
  0x1a   :  { %v121_v8 = vand.u32 4294901760, %v120_v7  ;;  %174 = vmatmul.f32.vlgmr.msra.gmra.mxu2 %v120_v7  ;;  %314 = vmatpush.msrb.mxu3 %v313_v30  ;;  %v343_v54 = vand.u32 4294901760, %v342_v51 }
  0x1b   :  { %220 = vmatpush.msrb.mxu0 %v145_v9  ;;  %v146_v11 = vsub.f32 %v144_v6, %v145_v9  ;;  %278 = vmatpush.msrb.mxu2 %v2057_v16  ;;  %v348_v55 = vsub.f32 %v346_v49, %v347_v52 }
  0x1c   :  { %v122_v10 = vsub.f32 %v120_v7, %v121_v8  ;;  %198 = vmatmul.f32.vlgmr.msra.gmra.mxu3 %v121_v8 }
  0x1d   :  { %v147_v13 = vand.u32 4294901760, %v146_v11  ;;  %280 = vmatpush.msrb.mxu2 %v2063_v19  ;;  %320 = vmatpush.msrb.mxu3 %v319_v36  ;;  %v349_v56 = vand.u32 4294901760, %v348_v55 }
  0x1e   :  { %v123_v12 = vand.u32 4294901760, %v122_v10 }
  0x1f   :  { %148 = vmatpush.msra.mxu1 %v147_v13  ;;  %282 = vmatpush.msrb.mxu2 %v2071_v23  ;;  %v499_v13 = vld [vmem:[%s2300_s5 + $0x30] sm:$0x3] }
  0x20   :  { %124 = vmatmul.f32.vlgmr.msra.gmra.mxu0 %v123_v12  ;;  %150 = vmatmul.f32.vlgmr.msra.gmra.mxu1 %v119_v5  ;;  %v508_v14 = vsel %vm264_vm2, %v499_v13, 0 }
  0x21   :  { %242 = vmatpush.msrb.mxu1 %v117_v4  ;;  %367 = vmatpush.msra.mxu0 %v310_v18  ;;  %v2101_v15 = vand.u32 4294901760, %v508_v14 }
  0x22   :  { %284 = vmatpush.msrb.mxu2 %v283_v28  ;;  %326 = vmatpush.msrb.mxu3 %v325_v42 }
  0x23   :  { %402 = vmatpush.msra.mxu1 %v2057_v16  ;;  %370 = vmatpush.msra.mxu0 %v316_v22  ;;  %v552_v17 = vsub.f32 %v508_v14, %v2101_v15 }
  0x24   :  { %286 = vmatpush.msrb.mxu2 %v285_v34  ;;  %332 = vmatpush.msrb.mxu3 %v331_v47 }
  0x25   :  { %404 = vmatpush.msra.mxu1 %v2063_v19  ;;  %373 = vmatpush.msra.mxu0 %v322_v27  ;;  %v553_v20 = vand.u32 4294901760, %v552_v17 }
  0x26   :  { %288 = vmatpush.msrb.mxu2 %v287_v39  ;;  %338 = vmatpush.msrb.mxu3 %v337_v53 }
  0x27   :  { %406 = vmatpush.msra.mxu1 %v2071_v23  ;;  %376 = vmatpush.msra.mxu0 %v328_v33  ;;  %v554_v24 = vsub.f32 %v552_v17, %v553_v20 }
  0x28   :  { %222 = vmatmul.f32.vlgmr.msrb.gmra.mxu0 %v119_v5  ;;  %244 = vmatmul.f32.vlgmr.msrb.gmra.mxu1 %v119_v5 }
  0x29   :  { %408 = vmatpush.msra.mxu1 %v283_v28  ;;  %379 = vmatpush.msra.mxu0 %v334_v40  ;;  %v555_v29 = vand.u32 4294901760, %v554_v24  ;;  %v493_v40 = vld [vmem:[%s2300_s5] sm:$0xff] }
  0x2a   :  { %290 = vmatpush.msrb.mxu2 %v289_v45  ;;  %344 = vmatpush.msrb.mxu3 %v343_v54 }
  0x2b   :  { %410 = vmatpush.msra.mxu1 %v285_v34  ;;  %382 = vmatpush.msra.mxu0 %v340_v44  ;;  %v531_v44 = vand.u32 4294901760, %v493_v40 }
  0x2c   :  { %434 = vmatpush.msra.mxu2 %v311_v21  ;;  %350 = vmatpush.msrb.mxu3 %v349_v56  ;;  %v1873_v56 = vld [vmem:[%s2299_s4] ss:$0 sm:$0xff] }
  0x2d   :  { %412 = vmatpush.msra.mxu1 %v287_v39  ;;  %385 = vmatpush.msra.mxu0 %v346_v49 }
  0x2e   :  { %438 = vmatpush.msra.mxu2 %v317_v26  ;;  %474 = vmatpush.msra.mxu3 %v2057_v16  ;;  %v498_v16 = vld [vmem:[%s2300_s5 + $0x28] sm:$0xff] }
  0x2f   :  { %414 = vmatpush.msra.mxu1 %v289_v45  ;;  %v2107_v18 = vand.u32 4294901760, %v498_v16  ;;  %520 = vmatpush.msrb.mxu0 %v2101_v15 }
  0x30   :  { %442 = vmatpush.msra.mxu2 %v323_v32  ;;  %476 = vmatpush.msra.mxu3 %v2063_v19  ;;  %v497_v19 = vld [vmem:[%s2300_s5 + $0x20] sm:$0xff] }
  0x31   :  { %v558_v21 = vsub.f32 %v498_v16, %v2107_v18  ;;  %v2115_v22 = vand.u32 4294901760, %v497_v19  ;;  %522 = vmatpush.msrb.mxu0 %v2107_v18  ;;  %556 = vmatpush.msrb.mxu1 %v555_v29 }
  0x32   :  { %446 = vmatpush.msra.mxu2 %v329_v38  ;;  %478 = vmatpush.msra.mxu3 %v2071_v23  ;;  %v496_v23 = vld [vmem:[%s2300_s5 + $0x18] sm:$0xff] }
  0x33   :  { %v559_v25 = vand.u32 4294901760, %v558_v21  ;;  %v564_v26 = vsub.f32 %v497_v19, %v2115_v22  ;;  %v525_v27 = vand.u32 4294901760, %v496_v23  ;;  %524 = vmatpush.msrb.mxu0 %v2115_v22 }
  0x34   :  { %450 = vmatpush.msra.mxu2 %v335_v46  ;;  %480 = vmatpush.msra.mxu3 %v283_v28  ;;  %v495_v28 = vld [vmem:[%s2300_s5 + $0x10] sm:$0xff] }
  0x35   :  { %v560_v30 = vsub.f32 %v558_v21, %v559_v25  ;;  %v565_v31 = vand.u32 4294901760, %v564_v26  ;;  %v570_v32 = vsub.f32 %v496_v23, %v525_v27  ;;  %526 = vmatpush.msrb.mxu0 %v525_v27  ;;  %v527_v33 = vand.u32 4294901760, %v495_v28 }
  0x36   :  { %454 = vmatpush.msra.mxu2 %v341_v48  ;;  %482 = vmatpush.msra.mxu3 %v285_v34  ;;  %v494_v34 = vld [vmem:[%s2300_s5 + $0x8] sm:$0xff]  ;;  %v588_v48 = vsub.f32 %v493_v40, %v531_v44 }
  0x37   :  { %v561_v35 = vand.u32 4294901760, %v560_v30  ;;  %v566_v36 = vsub.f32 %v564_v26, %v565_v31  ;;  %v571_v37 = vand.u32 4294901760, %v570_v32  ;;  %v529_v38 = vand.u32 4294901760, %v494_v34  ;;  %528 = vmatpush.msrb.mxu0 %v527_v33 }
  0x38   :  { %458 = vmatpush.msra.mxu2 %v347_v52  ;;  %484 = vmatpush.msra.mxu3 %v287_v39  ;;  %v576_v39 = vsub.f32 %v495_v28, %v527_v33  ;;  %v589_v51 = vand.u32 4294901760, %v588_v48 }
  0x39   :  { %562 = vmatpush.msrb.mxu1 %v561_v35  ;;  %v567_v41 = vand.u32 4294901760, %v566_v36  ;;  %v572_v42 = vsub.f32 %v570_v32, %v571_v37  ;;  %v582_v43 = vsub.f32 %v494_v34, %v529_v38  ;;  %530 = vmatpush.msrb.mxu0 %v529_v38 }
  0x3a   :  { %486 = vmatpush.msra.mxu3 %v289_v45  ;;  %v577_v45 = vand.u32 4294901760, %v576_v39  ;;  %v590_v54 = vsub.f32 %v588_v48, %v589_v51 }
  0x3b   :  { %568 = vmatpush.msrb.mxu1 %v567_v41  ;;  %v573_v46 = vand.u32 4294901760, %v572_v42  ;;  %v583_v47 = vand.u32 4294901760, %v582_v43  ;;  %532 = vmatpush.msrb.mxu0 %v531_v44 }
  0x3c   :  { %v578_v49 = vsub.f32 %v576_v39, %v577_v45  ;;  %v591_v55 = vand.u32 4294901760, %v590_v54 }
  0x3d   :  { %574 = vmatpush.msrb.mxu1 %v573_v46  ;;  %v584_v50 = vsub.f32 %v582_v43, %v583_v47 }
  0x3e   :  { %v579_v52 = vand.u32 4294901760, %v578_v49 }
  0x3f   :  { %v585_v53 = vand.u32 4294901760, %v584_v50 }
  0x40   :  { %580 = vmatpush.msrb.mxu1 %v579_v52 }
  0x42   :  { %586 = vmatpush.msrb.mxu1 %v585_v53 }
  0x44   :  { %592 = vmatpush.msrb.mxu1 %v591_v55  ;;  %v1874_v55 = vld [vmem:[%s2301_s6] ss:$0 sm:$0xff] }
  0x9d   :  { %v125_v58 = vpop.f32.mrf.mxu0  ;;  %v151_v60 = vpop.f32.mrf.mxu1 }
  0x9e   :  { %v126_v59 = vadd.f32 %v1872_v57, %v125_v58  ;;  %v175_v61 = vpop.f32.mrf.mxu2 }
  0x9f   :  { %v199_v63 = vpop.f32.mrf.mxu3 }
  0xa0   :  { %v152_v62 = vadd.f32 %v151_v60, %v126_v59 }
  0xa2   :  { %v176_v0 = vadd.f32 %v175_v61, %v152_v62 }
  0xa4   :  { %v200_v1 = vadd.f32 %v199_v63, %v176_v0 }
  0xa5   :  { %v223_v2 = vpop.f32.mrf.mxu0  ;;  %v245_v4 = vpop.f32.mrf.mxu1 }
  0xa6   :  { %v224_v3 = vadd.f32 %v223_v2, %v200_v1 }
  0xa8   :  { %v246_v5 = vadd.f32 %v245_v4, %v224_v3 }
  0xaa   :  { %1880 = vtanh.f32 %v246_v5 }
  0xb0   :  { %v1881_v6 = vpop.eup %1880 }
  0xb1   :  { %v262_v7 = vsel %vm260_vm3, %v1881_v6, 0 }
  0xb2   :  { %v291_v8 = vand.u32 4294901760, %v262_v7 }
  0xb4   :  { %352 = vmatmul.f32.vlgmr.msrb.gmra.mxu3 %v291_v8  ;;  %v292_v9 = vsub.f32 %v262_v7, %v291_v8 }
  0xb5   :  { %644 = vmatpush.msrb.mxu3 %v2101_v15 }
  0xb6   :  { %388 = vmatmul.f32.vlgmr.msra.gmra.mxu0 %v292_v9  ;;  %v293_v10 = vand.u32 4294901760, %v292_v9 }
  0xb7   :  { %646 = vmatpush.msrb.mxu3 %v2107_v18  ;;  %676 = vmatpush.msra.mxu0 %v553_v20 }
  0xb8   :  { %418 = vmatmul.f32.vlgmr.msra.gmra.mxu1 %v293_v10  ;;  %v294_v11 = vsub.f32 %v292_v9, %v293_v10 }
  0xb9   :  { %648 = vmatpush.msrb.mxu3 %v2115_v22  ;;  %680 = vmatpush.msra.mxu0 %v559_v25 }
  0xba   :  { %v295_v12 = vand.u32 4294901760, %v294_v11  ;;  %716 = vmatpush.msra.mxu1 %v2101_v15  ;;  %v740_v15 = vld [vmem:[%s2302_s7 + $0x28] sm:$0xff] }
  0xbb   :  { %650 = vmatpush.msrb.mxu3 %v525_v27  ;;  %684 = vmatpush.msra.mxu0 %v565_v31 }
  0xbc   :  { %296 = vmatmul.f32.vlgmr.msrb.gmra.mxu2 %v295_v12  ;;  %488 = vmatmul.f32.vlgmr.msra.gmra.mxu3 %v291_v8  ;;  %v741_v12 = vld [vmem:[%s2302_s7 + $0x30] sm:$0x3] }
  0xbd   :  { %609 = vmatpush.msrb.mxu2 %v552_v17  ;;  %652 = vmatpush.msrb.mxu3 %v527_v33  ;;  %v750_v13 = vsel %vm264_vm2, %v741_v12, 0  ;;  %v2151_v17 = vand.u32 4294901760, %v740_v15 }
  0xbe   :  { %688 = vmatpush.msra.mxu0 %v571_v37  ;;  %718 = vmatpush.msra.mxu1 %v2107_v18  ;;  %v2145_v14 = vand.u32 4294901760, %v750_v13  ;;  %v739_v18 = vld [vmem:[%s2302_s7 + $0x20] sm:$0xff] }
  0xbf   :  { %612 = vmatpush.msrb.mxu2 %v558_v21  ;;  %654 = vmatpush.msrb.mxu3 %v529_v38  ;;  %v800_v20 = vsub.f32 %v740_v15, %v2151_v17  ;;  %v2159_v21 = vand.u32 4294901760, %v739_v18 }
  0xc0   :  { %692 = vmatpush.msra.mxu0 %v577_v45  ;;  %720 = vmatpush.msra.mxu1 %v2115_v22  ;;  %v794_v16 = vsub.f32 %v750_v13, %v2145_v14  ;;  %v738_v22 = vld [vmem:[%s2302_s7 + $0x18] sm:$0xff] }
  0xc1   :  { %615 = vmatpush.msrb.mxu2 %v564_v26  ;;  %656 = vmatpush.msrb.mxu3 %v531_v44  ;;  %v801_v24 = vand.u32 4294901760, %v800_v20  ;;  %v806_v25 = vsub.f32 %v739_v18, %v2159_v21  ;;  %v767_v26 = vand.u32 4294901760, %v738_v22  ;;  %v1875_v18 = vld [vmem:[%s2303_s8] ss:$0 sm:$0xff] }
  0xc2   :  { %696 = vmatpush.msra.mxu0 %v583_v47  ;;  %722 = vmatpush.msra.mxu1 %v525_v27  ;;  %v795_v19 = vand.u32 4294901760, %v794_v16  ;;  %v737_v27 = vld [vmem:[%s2302_s7 + $0x10] sm:$0xff] }
  0xc3   :  { %618 = vmatpush.msrb.mxu2 %v570_v32  ;;  %v802_v29 = vsub.f32 %v800_v20, %v801_v24  ;;  %v807_v30 = vand.u32 4294901760, %v806_v25  ;;  %v812_v31 = vsub.f32 %v738_v22, %v767_v26  ;;  %v769_v32 = vand.u32 4294901760, %v737_v27 }
  0xc4   :  { %460 = vmatmul.f32.vlgmr.msra.gmra.mxu2 %v291_v8  ;;  %700 = vmatpush.msra.mxu0 %v589_v51  ;;  %v796_v23 = vsub.f32 %v794_v16, %v795_v19 }
  0xc5   :  { %621 = vmatpush.msrb.mxu2 %v576_v39  ;;  %724 = vmatpush.msra.mxu1 %v527_v33  ;;  %v736_v33 = vld [vmem:[%s2302_s7 + $0x8] sm:$0xff]  ;;  %v803_v34 = vand.u32 4294901760, %v802_v29  ;;  %v808_v35 = vsub.f32 %v806_v25, %v807_v30  ;;  %v813_v36 = vand.u32 4294901760, %v812_v31  ;;  %v735_v39 = vld [vmem:[%s2302_s7] sm:$0xff] }
  0xc6   :  { %v797_v28 = vand.u32 4294901760, %v796_v23  ;;  %v771_v37 = vand.u32 4294901760, %v736_v33 }
  0xc7   :  { %624 = vmatpush.msrb.mxu2 %v582_v43  ;;  %726 = vmatpush.msra.mxu1 %v529_v38  ;;  %v818_v38 = vsub.f32 %v737_v27, %v769_v32  ;;  %v809_v40 = vand.u32 4294901760, %v808_v35  ;;  %v814_v41 = vsub.f32 %v812_v31, %v813_v36  ;;  %v773_v43 = vand.u32 4294901760, %v735_v39 }
  0xc8   :  { %798 = vmatpush.msra.mxu3 %v797_v28  ;;  %v824_v42 = vsub.f32 %v736_v33, %v771_v37 }
  0xc9   :  { %627 = vmatpush.msrb.mxu2 %v588_v48  ;;  %728 = vmatpush.msra.mxu1 %v531_v44  ;;  %v819_v44 = vand.u32 4294901760, %v818_v38  ;;  %v815_v45 = vand.u32 4294901760, %v814_v41  ;;  %v830_v47 = vsub.f32 %v735_v39, %v773_v43  ;;  %v1141_v41 = vld [vmem:[#allocation2 + $0x28] sm:$0xff] }
  0xca   :  { %804 = vmatpush.msra.mxu3 %v803_v34  ;;  %v825_v46 = vand.u32 4294901760, %v824_v42 }
  0xcb   :  { %762 = vmatpush.msra.mxu2 %v2145_v14  ;;  %v820_v48 = vsub.f32 %v818_v38, %v819_v44  ;;  %v831_v50 = vand.u32 4294901760, %v830_v47 }
  0xcc   :  { %810 = vmatpush.msra.mxu3 %v809_v40  ;;  %v826_v49 = vsub.f32 %v824_v42, %v825_v46 }
  0xcd   :  { %764 = vmatpush.msra.mxu2 %v2151_v17  ;;  %v821_v51 = vand.u32 4294901760, %v820_v48  ;;  %v832_v53 = vsub.f32 %v830_v47, %v831_v50  ;;  %v1139_v48 = vld [vmem:[#allocation2 + $0x18] sm:$0xff] }
  0xce   :  { %816 = vmatpush.msra.mxu3 %v815_v45  ;;  %v827_v52 = vand.u32 4294901760, %v826_v49 }
  0xcf   :  { %766 = vmatpush.msra.mxu2 %v2159_v21  ;;  %v833_v54 = vand.u32 4294901760, %v832_v53  ;;  %v1138_v53 = vld [vmem:[#allocation2 + $0x10] sm:$0xff] }
  0xd0   :  { %822 = vmatpush.msra.mxu3 %v821_v51 }
  0xd1   :  { %768 = vmatpush.msra.mxu2 %v767_v26 }
  0xd2   :  { %828 = vmatpush.msra.mxu3 %v827_v52  ;;  %v2206_v52 = vand.u32 4294901760, %v1139_v48 }
  0xd3   :  { %770 = vmatpush.msra.mxu2 %v769_v32 }
  0xd4   :  { %834 = vmatpush.msra.mxu3 %v833_v54 }
  0xd5   :  { %772 = vmatpush.msra.mxu2 %v771_v37 }
  0xd7   :  { %774 = vmatpush.msra.mxu2 %v773_v43 }
 0x133   :  { %v389_v61 = vpop.f32.mrf.mxu0 }
 0x135   :  { %v419_v63 = vpop.f32.mrf.mxu1 }
 0x137   :  { %v353_v57 = vpop.f32.mrf.mxu3 }
 0x13f   :  { %v297_v58 = vpop.f32.mrf.mxu2  ;;  %v489_v3 = vpop.f32.mrf.mxu3 }
 0x140   :  { %v298_v59 = vadd.f32 %v1873_v56, %v297_v58 }
 0x142   :  { %v354_v60 = vadd.f32 %v353_v57, %v298_v59 }
 0x144   :  { %v390_v62 = vadd.f32 %v389_v61, %v354_v60 }
 0x146   :  { %v420_v0 = vadd.f32 %v419_v63, %v390_v62 }
 0x147   :  { %v461_v1 = vpop.f32.mrf.mxu2 }
 0x148   :  { %v462_v2 = vadd.f32 %v461_v1, %v420_v0 }
 0x14a   :  { %v490_v4 = vadd.f32 %v489_v3, %v462_v2 }
 0x14c   :  { %1882 = vtanh.f32 %v490_v4 }
 0x152   :  { %v1883_v5 = vpop.eup %1882 }
 0x153   :  { %v505_v6 = vsel %vm260_vm3, %v1883_v5, 0 }
 0x154   :  { %v533_v7 = vand.u32 4294901760, %v505_v6 }
 0x156   :  { %594 = vmatmul.f32.vlgmr.msrb.gmra.mxu1 %v533_v7  ;;  %v534_v8 = vsub.f32 %v505_v6, %v533_v7 }
 0x157   :  { %886 = vmatpush.msrb.mxu1 %v2145_v14 }
 0x158   :  { %630 = vmatmul.f32.vlgmr.msrb.gmra.mxu2 %v534_v8  ;;  %v535_v9 = vand.u32 4294901760, %v534_v8 }
 0x159   :  { %888 = vmatpush.msrb.mxu1 %v2151_v17  ;;  %918 = vmatpush.msrb.mxu2 %v795_v19 }
 0x15a   :  { %660 = vmatmul.f32.vlgmr.msrb.gmra.mxu3 %v535_v9  ;;  %v536_v10 = vsub.f32 %v534_v8, %v535_v9 }
 0x15b   :  { %890 = vmatpush.msrb.mxu1 %v2159_v21  ;;  %922 = vmatpush.msrb.mxu2 %v801_v24 }
 0x15c   :  { %v537_v11 = vand.u32 4294901760, %v536_v10  ;;  %958 = vmatpush.msrb.mxu3 %v2145_v14 }
 0x15d   :  { %892 = vmatpush.msrb.mxu1 %v767_v26  ;;  %926 = vmatpush.msrb.mxu2 %v807_v30 }
 0x15e   :  { %538 = vmatmul.f32.vlgmr.msrb.gmra.mxu0 %v537_v11  ;;  %730 = vmatmul.f32.vlgmr.msra.gmra.mxu1 %v533_v7  ;;  %v977_v11 = vld [vmem:[%s2304_s9] sm:$0x3] }
 0x15f   :  { %851 = vmatpush.msrb.mxu0 %v794_v16  ;;  %894 = vmatpush.msrb.mxu1 %v769_v32  ;;  %v987_v12 = vsel %vm264_vm2, %v977_v11, 0 }
 0x160   :  { %930 = vmatpush.msrb.mxu2 %v813_v36  ;;  %960 = vmatpush.msrb.mxu3 %v2151_v17  ;;  %v1004_v13 = vand.u32 4294901760, %v987_v12 }
 0x161   :  { %854 = vmatpush.msrb.mxu0 %v800_v20  ;;  %896 = vmatpush.msrb.mxu1 %v771_v37 }
 0x162   :  { %934 = vmatpush.msrb.mxu2 %v819_v44  ;;  %962 = vmatpush.msrb.mxu3 %v2159_v21  ;;  %v1031_v14 = vsub.f32 %v987_v12, %v1004_v13  ;;  %v1140_v44 = vld [vmem:[#allocation2 + $0x20] sm:$0xff] }
 0x163   :  { %857 = vmatpush.msrb.mxu0 %v806_v25  ;;  %898 = vmatpush.msrb.mxu1 %v773_v43 }
 0x164   :  { %938 = vmatpush.msrb.mxu2 %v825_v46  ;;  %964 = vmatpush.msrb.mxu3 %v767_v26  ;;  %v1032_v15 = vand.u32 4294901760, %v1031_v14 }
 0x165   :  { %860 = vmatpush.msrb.mxu0 %v812_v31 }
 0x166   :  { %702 = vmatmul.f32.vlgmr.msra.gmra.mxu0 %v533_v7  ;;  %942 = vmatpush.msrb.mxu2 %v831_v50  ;;  %v1033_v16 = vsub.f32 %v1031_v14, %v1032_v15 }
 0x167   :  { %863 = vmatpush.msrb.mxu0 %v818_v38  ;;  %966 = vmatpush.msrb.mxu3 %v769_v32  ;;  %v1142_v38 = vld [vmem:[#allocation2 + $0x30] sm:$0x3] }
 0x168   :  { %v1034_v17 = vand.u32 4294901760, %v1033_v16  ;;  %v1151_v39 = vsel %vm264_vm2, %v1142_v38, 0 }
 0x169   :  { %866 = vmatpush.msrb.mxu0 %v824_v42  ;;  %968 = vmatpush.msrb.mxu3 %v771_v37  ;;  %v2193_v40 = vand.u32 4294901760, %v1151_v39 }
 0x16a   :  { %1035 = vmatpush.msra.mxu1 %v1034_v17 }
 0x16b   :  { %869 = vmatpush.msrb.mxu0 %v830_v47  ;;  %970 = vmatpush.msrb.mxu3 %v773_v43  ;;  %v1195_v42 = vsub.f32 %v1151_v39, %v2193_v40  ;;  %v2196_v43 = vand.u32 4294901760, %v1141_v41  ;;  %v2201_v47 = vand.u32 4294901760, %v1140_v44 }
 0x16d   :  { %1005 = vmatpush.msra.mxu0 %v1004_v13  ;;  %v1196_v45 = vand.u32 4294901760, %v1195_v42  ;;  %v1201_v46 = vsub.f32 %v1141_v41, %v2196_v43  ;;  %v1207_v51 = vsub.f32 %v1140_v44, %v2201_v47 }
 0x16f   :  { %v1197_v49 = vsub.f32 %v1195_v42, %v1196_v45  ;;  %v1202_v50 = vand.u32 4294901760, %v1201_v46 }
 0x171   :  { %v1198_v54 = vand.u32 4294901760, %v1197_v49 }
 0x1d3   :  { %v595_v56 = vpop.f32.mrf.mxu1 }
 0x1db   :  { %v539_v57 = vpop.f32.mrf.mxu0  ;;  %v631_v60 = vpop.f32.mrf.mxu2 }
 0x1dc   :  { %v540_v58 = vadd.f32 %v1874_v55, %v539_v57  ;;  %v731_v2 = vpop.f32.mrf.mxu1  ;;  %v1203_v55 = vsub.f32 %v1201_v46, %v1202_v50  ;;  %v1213_v57 = vsub.f32 %v1139_v48, %v2206_v52 }
 0x1dd   :  { %v661_v62 = vpop.f32.mrf.mxu3 }
 0x1de   :  { %v596_v59 = vadd.f32 %v595_v56, %v540_v58  ;;  %v1208_v56 = vand.u32 4294901760, %v1207_v51  ;;  %v1170_v58 = vand.u32 4294901760, %v1138_v53 }
 0x1e0   :  { %v632_v61 = vadd.f32 %v631_v60, %v596_v59  ;;  %v1137_v59 = vld [vmem:[#allocation2 + $0x8] sm:$0xff]  ;;  %v1204_v60 = vand.u32 4294901760, %v1203_v55 }
 0x1e2   :  { %v662_v63 = vadd.f32 %v661_v62, %v632_v61  ;;  %v1209_v61 = vsub.f32 %v1207_v51, %v1208_v56  ;;  %v1214_v62 = vand.u32 4294901760, %v1213_v57 }
 0x1e3   :  { %v703_v0 = vpop.f32.mrf.mxu0 }
 0x1e4   :  { %v704_v1 = vadd.f32 %v703_v0, %v662_v63  ;;  %v1172_v63 = vand.u32 4294901760, %v1137_v59  ;;  %v1219_v0 = vsub.f32 %v1138_v53, %v1170_v58 }
 0x1e6   :  { %v732_v3 = vadd.f32 %v731_v2, %v704_v1  ;;  %v1136_v1 = vld [vmem:[#allocation2] sm:$0xff]  ;;  %v1210_v2 = vand.u32 4294901760, %v1209_v61 }
 0x1e8   :  { %1884 = vtanh.f32 %v732_v3  ;;  %v1215_v3 = vsub.f32 %v1213_v57, %v1214_v62 }
 0x1ee   :  { %v1885_v4 = vpop.eup %1884 }
 0x1ef   :  { %v747_v5 = vsel %vm260_vm3, %v1885_v4, 0  ;;  %v1225_v4 = vsub.f32 %v1137_v59, %v1172_v63 }
 0x1f0   :  { %v775_v6 = vand.u32 4294901760, %v747_v5 }
 0x1f2   :  { %836 = vmatmul.f32.vlgmr.msra.gmra.mxu3 %v775_v6  ;;  %v776_v7 = vsub.f32 %v747_v5, %v775_v6  ;;  %v1174_v5 = vand.u32 4294901760, %v1136_v1 }
 0x1f3   :  { %1199 = vmatpush.msra.mxu3 %v1198_v54 }
 0x1f4   :  { %872 = vmatmul.f32.vlgmr.msrb.gmra.mxu0 %v776_v7  ;;  %v777_v8 = vand.u32 4294901760, %v776_v7 }
 0x1f5   :  { %1058 = vmatpush.msrb.mxu0 %v1031_v14  ;;  %1205 = vmatpush.msra.mxu3 %v1204_v60 }
 0x1f6   :  { %902 = vmatmul.f32.vlgmr.msrb.gmra.mxu1 %v777_v8  ;;  %v778_v9 = vsub.f32 %v776_v7, %v777_v8  ;;  %v1216_v7 = vand.u32 4294901760, %v1215_v3  ;;  %v1226_v8 = vand.u32 4294901760, %v1225_v4 }
 0x1f7   :  { %1081 = vmatpush.msrb.mxu1 %v1004_v13  ;;  %1211 = vmatpush.msra.mxu3 %v1210_v2 }
 0x1f8   :  { %v779_v10 = vand.u32 4294901760, %v778_v9  ;;  %v1231_v9 = vsub.f32 %v1136_v1, %v1174_v5  ;;  %v1227_v11 = vsub.f32 %v1225_v4, %v1226_v8 }
 0x1f9   :  { %1217 = vmatpush.msra.mxu3 %v1216_v7 }
 0x1fa   :  { %780 = vmatmul.f32.vlgmr.msra.gmra.mxu2 %v779_v10  ;;  %972 = vmatmul.f32.vlgmr.msrb.gmra.mxu3 %v775_v6  ;;  %v1232_v12 = vand.u32 4294901760, %v1231_v9  ;;  %v1228_v14 = vand.u32 4294901760, %v1227_v11 }
 0x1fb   :  { %1163 = vmatpush.msra.mxu2 %v2193_v40 }
 0x1fd   :  { %1165 = vmatpush.msra.mxu2 %v2196_v43 }
 0x1ff   :  { %1167 = vmatpush.msra.mxu2 %v2201_v47 }
 0x201   :  { %1169 = vmatpush.msra.mxu2 %v2206_v52 }
 0x202   :  { %944 = vmatmul.f32.vlgmr.msrb.gmra.mxu2 %v775_v6  ;;  %v1220_v6 = vand.u32 4294901760, %v1219_v0 }
 0x203   :  { %1171 = vmatpush.msra.mxu2 %v1170_v58 }
 0x204   :  { %v1221_v10 = vsub.f32 %v1219_v0, %v1220_v6 }
 0x205   :  { %1173 = vmatpush.msra.mxu2 %v1172_v63 }
 0x207   :  { %1175 = vmatpush.msra.mxu2 %v1174_v5 }
 0x209   :  { %1319 = vmatpush.msrb.mxu2 %v1196_v45 }
 0x20b   :  { %1323 = vmatpush.msrb.mxu2 %v1202_v50 }
 0x20d   :  { %1327 = vmatpush.msrb.mxu2 %v1208_v56 }
 0x20f   :  { %1331 = vmatpush.msrb.mxu2 %v1214_v62 }
 0x211   :  { %1335 = vmatpush.msrb.mxu2 %v1220_v6 }
 0x213   :  { %1339 = vmatpush.msrb.mxu2 %v1226_v8 }
 0x215   :  { %1343 = vmatpush.msrb.mxu2 %v1232_v12 }
 0x271   :  { %v873_v23 = vpop.f32.mrf.mxu0 }
 0x273   :  { %v903_v25 = vpop.f32.mrf.mxu1 }
 0x275   :  { %v837_v19 = vpop.f32.mrf.mxu3 }
 0x27d   :  { %v781_v20 = vpop.f32.mrf.mxu2  ;;  %v973_v29 = vpop.f32.mrf.mxu3 }
 0x27e   :  { %v782_v21 = vadd.f32 %v1875_v18, %v781_v20 }
 0x280   :  { %v838_v22 = vadd.f32 %v837_v19, %v782_v21  ;;  %v1876_v19 = vld [vmem:[%s2305_s10] ss:$0 sm:$0xff] }
 0x282   :  { %v874_v24 = vadd.f32 %v873_v23, %v838_v22 }
 0x284   :  { %v904_v26 = vadd.f32 %v903_v25, %v874_v24 }
 0x285   :  { %v945_v27 = vpop.f32.mrf.mxu2 }
 0x286   :  { %v946_v28 = vadd.f32 %v945_v27, %v904_v26 }
 0x288   :  { %v974_v30 = vadd.f32 %v973_v29, %v946_v28 }
 0x28a   :  { %1886 = vtanh.f32 %v974_v30 }
 0x290   :  { %v1887_v31 = vpop.eup %1886 }
 0x291   :  { %v984_v32 = vsel %vm982_vm4, %v1887_v31, 0 }
 0x292   :  { %v1006_v33 = vand.u32 4294901760, %v984_v32 }
 0x294   :  { %v1007_v34 = vsub.f32 %v984_v32, %v1006_v33  ;;  %1037 = vmatmul.f32.vlgmr.msra.gmra.mxu1 %v1006_v33 }
 0x295   :  { %1129 = vmatpush.msra.mxu1 %v1004_v13  ;;  %v1222_v13 = vand.u32 4294901760, %v1221_v10 }
 0x296   :  { %v1008_v35 = vand.u32 4294901760, %v1007_v34 }
 0x297   :  { %1223 = vmatpush.msra.mxu3 %v1222_v13 }
 0x298   :  { %v1009_v36 = vsub.f32 %v1007_v34, %v1008_v35 }
 0x299   :  { %1229 = vmatpush.msra.mxu3 %v1228_v14 }
 0x29a   :  { %v1010_v37 = vand.u32 4294901760, %v1009_v36 }
 0x29c   :  { %1011 = vmatmul.f32.vlgmr.msra.gmra.mxu0 %v1010_v37  ;;  %1085 = vmatmul.f32.vlgmr.msrb.gmra.mxu1 %v1008_v35  ;;  %v1384_v37 = vld [vmem:[#allocation4 + $0x30] sm:$0x3] }
 0x29d   :  { %1107 = vmatpush.msra.mxu0 %v1032_v15  ;;  %1287 = vmatpush.msrb.mxu1 %v2193_v40  ;;  %v1233_v15 = vsub.f32 %v1231_v9, %v1232_v12  ;;  %v1393_v38 = vsel %vm264_vm2, %v1384_v37, 0 }
 0x29e   :  { %v2222_v39 = vand.u32 4294901760, %v1393_v38 }
 0x29f   :  { %1289 = vmatpush.msrb.mxu1 %v2196_v43  ;;  %v1234_v16 = vand.u32 4294901760, %v1233_v15 }
 0x2a0   :  { %v1437_v41 = vsub.f32 %v1393_v38, %v2222_v39 }
 0x2a1   :  { %1291 = vmatpush.msrb.mxu1 %v2201_v47  ;;  %1235 = vmatpush.msra.mxu3 %v1234_v16  ;;  %v1877_v16 = vld [vmem:[%s2307_s12] ss:$0 sm:$0xff] }
 0x2a2   :  { %v1438_v44 = vand.u32 4294901760, %v1437_v41 }
 0x2a3   :  { %1293 = vmatpush.msrb.mxu1 %v2206_v52  ;;  %1359 = vmatpush.msrb.mxu3 %v2193_v40  ;;  %v1383_v40 = vld [vmem:[#allocation4 + $0x28] sm:$0xff] }
 0x2a4   :  { %1061 = vmatmul.f32.vlgmr.msrb.gmra.mxu0 %v1007_v34  ;;  %1131 = vmatmul.f32.vlgmr.msra.gmra.mxu1 %v1006_v33  ;;  %v1439_v48 = vsub.f32 %v1437_v41, %v1438_v44 }
 0x2a5   :  { %1252 = vmatpush.msrb.mxu0 %v1195_v42  ;;  %1295 = vmatpush.msrb.mxu1 %v1170_v58  ;;  %v2225_v42 = vand.u32 4294901760, %v1383_v40 }
 0x2a6   :  { %1361 = vmatpush.msrb.mxu3 %v2196_v43  ;;  %v1382_v43 = vld [vmem:[#allocation4 + $0x20] sm:$0xff]  ;;  %v1440_v53 = vand.u32 4294901760, %v1439_v48 }
 0x2a7   :  { %1255 = vmatpush.msrb.mxu0 %v1201_v46  ;;  %1297 = vmatpush.msrb.mxu1 %v1172_v63  ;;  %v1443_v45 = vsub.f32 %v1383_v40, %v2225_v42  ;;  %v2230_v46 = vand.u32 4294901760, %v1382_v43 }
 0x2a8   :  { %1363 = vmatpush.msrb.mxu3 %v2201_v47  ;;  %v1381_v47 = vld [vmem:[#allocation4 + $0x18] sm:$0xff] }
 0x2a9   :  { %1258 = vmatpush.msrb.mxu0 %v1207_v51  ;;  %1299 = vmatpush.msrb.mxu1 %v1174_v5  ;;  %v1444_v49 = vand.u32 4294901760, %v1443_v45  ;;  %v1449_v50 = vsub.f32 %v1382_v43, %v2230_v46  ;;  %v1410_v51 = vand.u32 4294901760, %v1381_v47 }
 0x2aa   :  { %1365 = vmatpush.msrb.mxu3 %v2206_v52  ;;  %v1380_v52 = vld [vmem:[#allocation4 + $0x10] sm:$0xff] }
 0x2ab   :  { %1261 = vmatpush.msrb.mxu0 %v1213_v57  ;;  %v1445_v54 = vsub.f32 %v1443_v45, %v1444_v49  ;;  %v1450_v55 = vand.u32 4294901760, %v1449_v50  ;;  %v1455_v56 = vsub.f32 %v1381_v47, %v1410_v51  ;;  %v1412_v57 = vand.u32 4294901760, %v1380_v52  ;;  %1441 = vmatpush.msra.mxu1 %v1440_v53 }
 0x2ac   :  { %1109 = vmatmul.f32.vlgmr.msra.gmra.mxu0 %v1006_v33  ;;  %1367 = vmatpush.msrb.mxu3 %v1170_v58  ;;  %v1379_v58 = vld [vmem:[#allocation4 + $0x8] sm:$0xff] }
 0x2ad   :  { %1264 = vmatpush.msrb.mxu0 %v1219_v0  ;;  %v1446_v59 = vand.u32 4294901760, %v1445_v54  ;;  %v1451_v60 = vsub.f32 %v1449_v50, %v1450_v55  ;;  %v1456_v61 = vand.u32 4294901760, %v1455_v56  ;;  %v1414_v62 = vand.u32 4294901760, %v1379_v58  ;;  %v1378_v0 = vld [vmem:[#allocation4] sm:$0xff] }
 0x2ae   :  { %1369 = vmatpush.msrb.mxu3 %v1172_v63  ;;  %v1461_v63 = vsub.f32 %v1380_v52, %v1412_v57 }
 0x2af   :  { %1267 = vmatpush.msrb.mxu0 %v1225_v4  ;;  %1447 = vmatpush.msra.mxu1 %v1446_v59  ;;  %v1452_v1 = vand.u32 4294901760, %v1451_v60  ;;  %v1457_v2 = vsub.f32 %v1455_v56, %v1456_v61  ;;  %v1467_v3 = vsub.f32 %v1379_v58, %v1414_v62  ;;  %v1416_v4 = vand.u32 4294901760, %v1378_v0 }
 0x2b0   :  { %1371 = vmatpush.msrb.mxu3 %v1174_v5  ;;  %v1462_v5 = vand.u32 4294901760, %v1461_v63 }
 0x2b1   :  { %1270 = vmatpush.msrb.mxu0 %v1231_v9  ;;  %1453 = vmatpush.msra.mxu1 %v1452_v1  ;;  %v1458_v6 = vand.u32 4294901760, %v1457_v2  ;;  %v1468_v7 = vand.u32 4294901760, %v1467_v3  ;;  %v1473_v8 = vsub.f32 %v1378_v0, %v1416_v4 }
 0x2b2   :  { %v1463_v9 = vsub.f32 %v1461_v63, %v1462_v5 }
 0x2b3   :  { %1405 = vmatpush.msra.mxu0 %v2222_v39  ;;  %1459 = vmatpush.msra.mxu1 %v1458_v6  ;;  %v1469_v10 = vsub.f32 %v1467_v3, %v1468_v7  ;;  %v1474_v11 = vand.u32 4294901760, %v1473_v8 }
 0x2b4   :  { %v1464_v12 = vand.u32 4294901760, %v1463_v9 }
 0x2b5   :  { %1407 = vmatpush.msra.mxu0 %v2225_v42  ;;  %v1470_v13 = vand.u32 4294901760, %v1469_v10  ;;  %v1475_v14 = vsub.f32 %v1473_v8, %v1474_v11 }
 0x2b6   :  { %1465 = vmatpush.msra.mxu1 %v1464_v12 }
 0x2b7   :  { %1409 = vmatpush.msra.mxu0 %v2230_v46  ;;  %v1476_v15 = vand.u32 4294901760, %v1475_v14 }
 0x2b8   :  { %1471 = vmatpush.msra.mxu1 %v1470_v13 }
 0x2b9   :  { %1411 = vmatpush.msra.mxu0 %v1410_v51 }
 0x2ba   :  { %1477 = vmatpush.msra.mxu1 %v1476_v15  ;;  %v1878_v15 = vld [vmem:[%s2309_s14] ss:$0 sm:$0xff] }
 0x2bb   :  { %1413 = vmatpush.msra.mxu0 %v1412_v57 }
 0x2bd   :  { %1415 = vmatpush.msra.mxu0 %v1414_v62 }
 0x2bf   :  { %1417 = vmatpush.msra.mxu0 %v1416_v4 }
 0x311   :  { %v1038_v17 = vpop.f32.mrf.mxu1 }
 0x319   :  { %v1012_v18 = vpop.f32.mrf.mxu0  ;;  %v1086_v21 = vpop.f32.mrf.mxu1 }
 0x31a   :  { %v1013_v20 = vadd.f32 %v1876_v19, %v1012_v18 }
 0x31c   :  { %v1039_v23 = vadd.f32 %v1038_v17, %v1013_v20 }
 0x321   :  { %v1062_v22 = vpop.f32.mrf.mxu0  ;;  %v1132_v28 = vpop.f32.mrf.mxu1 }
 0x322   :  { %v1063_v24 = vadd.f32 %v1062_v22, %v1039_v23 }
 0x324   :  { %v1087_v25 = vadd.f32 %v1086_v21, %v1063_v24 }
 0x329   :  { %v1110_v26 = vpop.f32.mrf.mxu0 }
 0x32a   :  { %v1111_v27 = vadd.f32 %v1110_v26, %v1087_v25 }
 0x32c   :  { %v1133_v29 = vadd.f32 %v1132_v28, %v1111_v27 }
 0x32e   :  { %1888 = vtanh.f32 %v1133_v29 }
 0x334   :  { %v1889_v30 = vpop.eup %1888 }
 0x335   :  { %v1148_v31 = vsel %vm260_vm3, %v1889_v30, 0 }
 0x336   :  { %v1176_v32 = vand.u32 4294901760, %v1148_v31 }
 0x338   :  { %1237 = vmatmul.f32.vlgmr.msra.gmra.mxu3 %v1176_v32  ;;  %v1177_v33 = vsub.f32 %v1148_v31, %v1176_v32 }
 0x339   :  { %1529 = vmatpush.msra.mxu3 %v2222_v39 }
 0x33a   :  { %1273 = vmatmul.f32.vlgmr.msrb.gmra.mxu0 %v1177_v33  ;;  %v1178_v34 = vand.u32 4294901760, %v1177_v33 }
 0x33b   :  { %1531 = vmatpush.msra.mxu3 %v2225_v42  ;;  %1561 = vmatpush.msrb.mxu0 %v1438_v44 }
 0x33c   :  { %1303 = vmatmul.f32.vlgmr.msrb.gmra.mxu1 %v1178_v34  ;;  %v1179_v35 = vsub.f32 %v1177_v33, %v1178_v34 }
 0x33d   :  { %1533 = vmatpush.msra.mxu3 %v2230_v46  ;;  %1565 = vmatpush.msrb.mxu0 %v1444_v49 }
 0x33e   :  { %v1180_v36 = vand.u32 4294901760, %v1179_v35  ;;  %1601 = vmatpush.msrb.mxu1 %v2222_v39  ;;  %v1625_v39 = vld [vmem:[%s2310_s15 + $0x28] sm:$0xff] }
 0x33f   :  { %1535 = vmatpush.msra.mxu3 %v1410_v51  ;;  %1569 = vmatpush.msrb.mxu0 %v1450_v55 }
 0x340   :  { %1181 = vmatmul.f32.vlgmr.msra.gmra.mxu2 %v1180_v36  ;;  %1373 = vmatmul.f32.vlgmr.msrb.gmra.mxu3 %v1176_v32  ;;  %v1626_v36 = vld [vmem:[%s2310_s15 + $0x30] sm:$0x3] }
 0x341   :  { %1494 = vmatpush.msra.mxu2 %v1437_v41  ;;  %1537 = vmatpush.msra.mxu3 %v1412_v57  ;;  %v1635_v37 = vsel %vm264_vm2, %v1626_v36, 0  ;;  %v2254_v41 = vand.u32 4294901760, %v1625_v39 }
 0x342   :  { %1573 = vmatpush.msrb.mxu0 %v1456_v61  ;;  %1603 = vmatpush.msrb.mxu1 %v2225_v42  ;;  %v2248_v38 = vand.u32 4294901760, %v1635_v37  ;;  %v1624_v42 = vld [vmem:[%s2310_s15 + $0x20] sm:$0xff] }
 0x343   :  { %1497 = vmatpush.msra.mxu2 %v1443_v45  ;;  %1539 = vmatpush.msra.mxu3 %v1414_v62  ;;  %v1685_v44 = vsub.f32 %v1625_v39, %v2254_v41  ;;  %v2262_v45 = vand.u32 4294901760, %v1624_v42 }
 0x344   :  { %1577 = vmatpush.msrb.mxu0 %v1462_v5  ;;  %1605 = vmatpush.msrb.mxu1 %v2230_v46  ;;  %v1679_v40 = vsub.f32 %v1635_v37, %v2248_v38  ;;  %v1623_v46 = vld [vmem:[%s2310_s15 + $0x18] sm:$0xff] }
 0x345   :  { %1500 = vmatpush.msra.mxu2 %v1449_v50  ;;  %1541 = vmatpush.msra.mxu3 %v1416_v4  ;;  %v1686_v48 = vand.u32 4294901760, %v1685_v44  ;;  %v1691_v49 = vsub.f32 %v1624_v42, %v2262_v45  ;;  %v1652_v50 = vand.u32 4294901760, %v1623_v46 }
 0x346   :  { %1581 = vmatpush.msrb.mxu0 %v1468_v7  ;;  %1607 = vmatpush.msrb.mxu1 %v1410_v51  ;;  %v1680_v43 = vand.u32 4294901760, %v1679_v40  ;;  %v1622_v51 = vld [vmem:[%s2310_s15 + $0x10] sm:$0xff] }
 0x347   :  { %1503 = vmatpush.msra.mxu2 %v1455_v56  ;;  %v1687_v53 = vsub.f32 %v1685_v44, %v1686_v48  ;;  %v1692_v54 = vand.u32 4294901760, %v1691_v49  ;;  %v1697_v55 = vsub.f32 %v1623_v46, %v1652_v50  ;;  %v1654_v56 = vand.u32 4294901760, %v1622_v51 }
 0x348   :  { %1345 = vmatmul.f32.vlgmr.msrb.gmra.mxu2 %v1176_v32  ;;  %1585 = vmatpush.msrb.mxu0 %v1474_v11  ;;  %v1681_v47 = vsub.f32 %v1679_v40, %v1680_v43 }
 0x349   :  { %1506 = vmatpush.msra.mxu2 %v1461_v63  ;;  %1609 = vmatpush.msrb.mxu1 %v1412_v57  ;;  %v1621_v57 = vld [vmem:[%s2310_s15 + $0x8] sm:$0xff]  ;;  %v1688_v58 = vand.u32 4294901760, %v1687_v53  ;;  %v1693_v59 = vsub.f32 %v1691_v49, %v1692_v54  ;;  %v1698_v60 = vand.u32 4294901760, %v1697_v55  ;;  %v1620_v63 = vld [vmem:[%s2310_s15] sm:$0xff] }
 0x34a   :  { %v1682_v52 = vand.u32 4294901760, %v1681_v47  ;;  %v1656_v61 = vand.u32 4294901760, %v1621_v57 }
 0x34b   :  { %1509 = vmatpush.msra.mxu2 %v1467_v3  ;;  %1611 = vmatpush.msrb.mxu1 %v1414_v62  ;;  %v1703_v62 = vsub.f32 %v1622_v51, %v1654_v56  ;;  %v1694_v0 = vand.u32 4294901760, %v1693_v59  ;;  %v1699_v1 = vsub.f32 %v1697_v55, %v1698_v60  ;;  %v1658_v3 = vand.u32 4294901760, %v1620_v63 }
 0x34c   :  { %1683 = vmatpush.msrb.mxu3 %v1682_v52  ;;  %v1709_v2 = vsub.f32 %v1621_v57, %v1656_v61 }
 0x34d   :  { %1512 = vmatpush.msra.mxu2 %v1473_v8  ;;  %1613 = vmatpush.msrb.mxu1 %v1416_v4  ;;  %v1704_v4 = vand.u32 4294901760, %v1703_v62  ;;  %v1700_v5 = vand.u32 4294901760, %v1699_v1  ;;  %v1715_v7 = vsub.f32 %v1620_v63, %v1658_v3 }
 0x34e   :  { %1689 = vmatpush.msrb.mxu3 %v1688_v58  ;;  %v1710_v6 = vand.u32 4294901760, %v1709_v2 }
 0x34f   :  { %1647 = vmatpush.msrb.mxu2 %v2248_v38  ;;  %v1705_v8 = vsub.f32 %v1703_v62, %v1704_v4  ;;  %v1716_v10 = vand.u32 4294901760, %v1715_v7 }
 0x350   :  { %1695 = vmatpush.msrb.mxu3 %v1694_v0  ;;  %v1711_v9 = vsub.f32 %v1709_v2, %v1710_v6 }
 0x351   :  { %1649 = vmatpush.msrb.mxu2 %v2254_v41  ;;  %v1706_v11 = vand.u32 4294901760, %v1705_v8  ;;  %v1717_v13 = vsub.f32 %v1715_v7, %v1716_v10 }
 0x352   :  { %1701 = vmatpush.msrb.mxu3 %v1700_v5  ;;  %v1712_v12 = vand.u32 4294901760, %v1711_v9 }
 0x353   :  { %1651 = vmatpush.msrb.mxu2 %v2262_v45  ;;  %v1718_v14 = vand.u32 4294901760, %v1717_v13 }
 0x354   :  { %1707 = vmatpush.msrb.mxu3 %v1706_v11 }
 0x355   :  { %1653 = vmatpush.msrb.mxu2 %v1652_v50 }
 0x356   :  { %1713 = vmatpush.msrb.mxu3 %v1712_v12 }
 0x357   :  { %1655 = vmatpush.msrb.mxu2 %v1654_v56 }
 0x358   :  { %1719 = vmatpush.msrb.mxu3 %v1718_v14 }
 0x359   :  { %1657 = vmatpush.msrb.mxu2 %v1656_v61 }
 0x35b   :  { %1659 = vmatpush.msrb.mxu2 %v1658_v3 }
 0x3b7   :  { %v1274_v21 = vpop.f32.mrf.mxu0 }
 0x3b9   :  { %v1304_v23 = vpop.f32.mrf.mxu1 }
 0x3bb   :  { %v1238_v17 = vpop.f32.mrf.mxu3 }
 0x3c3   :  { %v1182_v18 = vpop.f32.mrf.mxu2  ;;  %v1374_v27 = vpop.f32.mrf.mxu3 }
 0x3c4   :  { %v1183_v19 = vadd.f32 %v1877_v16, %v1182_v18 }
 0x3c6   :  { %v1239_v20 = vadd.f32 %v1238_v17, %v1183_v19 }
 0x3c8   :  { %v1275_v22 = vadd.f32 %v1274_v21, %v1239_v20 }
 0x3ca   :  { %v1305_v24 = vadd.f32 %v1304_v23, %v1275_v22 }
 0x3cb   :  { %v1346_v25 = vpop.f32.mrf.mxu2 }
 0x3cc   :  { %v1347_v26 = vadd.f32 %v1346_v25, %v1305_v24 }
 0x3ce   :  { %v1375_v28 = vadd.f32 %v1374_v27, %v1347_v26 }
 0x3d0   :  { %1890 = vtanh.f32 %v1375_v28 }
 0x3d6   :  { %v1891_v29 = vpop.eup %1890 }
 0x3d7   :  { %v1390_v30 = vsel %vm260_vm3, %v1891_v29, 0 }
 0x3d8   :  { %v1418_v31 = vand.u32 4294901760, %v1390_v30 }
 0x3da   :  { %1479 = vmatmul.f32.vlgmr.msra.gmra.mxu1 %v1418_v31  ;;  %v1419_v32 = vsub.f32 %v1390_v30, %v1418_v31 }
 0x3db   :  { %1771 = vmatpush.msra.mxu1 %v2248_v38 }
 0x3dc   :  { %1515 = vmatmul.f32.vlgmr.msra.gmra.mxu2 %v1419_v32  ;;  %v1420_v33 = vand.u32 4294901760, %v1419_v32 }
 0x3dd   :  { %1773 = vmatpush.msra.mxu1 %v2254_v41  ;;  %1803 = vmatpush.msra.mxu2 %v1680_v43 }
 0x3de   :  { %1545 = vmatmul.f32.vlgmr.msra.gmra.mxu3 %v1420_v33  ;;  %v1421_v34 = vsub.f32 %v1419_v32, %v1420_v33 }
 0x3df   :  { %1775 = vmatpush.msra.mxu1 %v2262_v45  ;;  %1807 = vmatpush.msra.mxu2 %v1686_v48 }
 0x3e0   :  { %v1422_v35 = vand.u32 4294901760, %v1421_v34  ;;  %1843 = vmatpush.msra.mxu3 %v2248_v38 }
 0x3e1   :  { %1777 = vmatpush.msra.mxu1 %v1652_v50  ;;  %1811 = vmatpush.msra.mxu2 %v1692_v54 }
 0x3e2   :  { %1423 = vmatmul.f32.vlgmr.msra.gmra.mxu0 %v1422_v35  ;;  %1615 = vmatmul.f32.vlgmr.msrb.gmra.mxu1 %v1418_v31  ;;  %v1879_v35 = vld [vmem:[%s2311_s16] ss:$0 sm:$0xff] }
 0x3e3   :  { %1736 = vmatpush.msra.mxu0 %v1679_v40  ;;  %1779 = vmatpush.msra.mxu1 %v1654_v56 }
 0x3e4   :  { %1815 = vmatpush.msra.mxu2 %v1698_v60  ;;  %1845 = vmatpush.msra.mxu3 %v2254_v41 }
 0x3e5   :  { %1739 = vmatpush.msra.mxu0 %v1685_v44  ;;  %1781 = vmatpush.msra.mxu1 %v1656_v61 }
 0x3e6   :  { %1819 = vmatpush.msra.mxu2 %v1704_v4  ;;  %1847 = vmatpush.msra.mxu3 %v2262_v45 }
 0x3e7   :  { %1742 = vmatpush.msra.mxu0 %v1691_v49  ;;  %1783 = vmatpush.msra.mxu1 %v1658_v3 }
 0x3e8   :  { %1823 = vmatpush.msra.mxu2 %v1710_v6  ;;  %1849 = vmatpush.msra.mxu3 %v1652_v50 }
 0x3e9   :  { %1745 = vmatpush.msra.mxu0 %v1697_v55 }
 0x3ea   :  { %1587 = vmatmul.f32.vlgmr.msrb.gmra.mxu0 %v1418_v31  ;;  %1827 = vmatpush.msra.mxu2 %v1716_v10 }
 0x3eb   :  { %1748 = vmatpush.msra.mxu0 %v1703_v62  ;;  %1851 = vmatpush.msra.mxu3 %v1654_v56 }
 0x3ed   :  { %1751 = vmatpush.msra.mxu0 %v1709_v2  ;;  %1853 = vmatpush.msra.mxu3 %v1656_v61 }
 0x3ef   :  { %1754 = vmatpush.msra.mxu0 %v1715_v7  ;;  %1855 = vmatpush.msra.mxu3 %v1658_v3 }
 0x457   :  { %v1480_v16 = vpop.f32.mrf.mxu1 }
 0x45f   :  { %v1424_v17 = vpop.f32.mrf.mxu0  ;;  %v1516_v20 = vpop.f32.mrf.mxu2 }
 0x460   :  { %v1425_v18 = vadd.f32 %v1878_v15, %v1424_v17  ;;  %v1616_v26 = vpop.f32.mrf.mxu1 }
 0x461   :  { %v1546_v22 = vpop.f32.mrf.mxu3 }
 0x462   :  { %v1481_v19 = vadd.f32 %v1480_v16, %v1425_v18 }
 0x464   :  { %v1517_v21 = vadd.f32 %v1516_v20, %v1481_v19 }
 0x466   :  { %v1547_v23 = vadd.f32 %v1546_v22, %v1517_v21 }
 0x467   :  { %v1588_v24 = vpop.f32.mrf.mxu0 }
 0x468   :  { %v1589_v25 = vadd.f32 %v1588_v24, %v1547_v23 }
 0x46a   :  { %v1617_v27 = vadd.f32 %v1616_v26, %v1589_v25 }
 0x46c   :  { %1892 = vtanh.f32 %v1617_v27 }
 0x472   :  { %v1893_v28 = vpop.eup %1892 }
 0x473   :  { %v1632_v29 = vsel %vm260_vm3, %v1893_v28, 0 }
 0x474   :  { %v1660_v30 = vand.u32 4294901760, %v1632_v29 }
 0x476   :  { %1721 = vmatmul.f32.vlgmr.msrb.gmra.mxu3 %v1660_v30  ;;  %v1661_v31 = vsub.f32 %v1632_v29, %v1660_v30 }
 0x478   :  { %1757 = vmatmul.f32.vlgmr.msra.gmra.mxu0 %v1661_v31  ;;  %v1662_v32 = vand.u32 4294901760, %v1661_v31 }
 0x47a   :  { %1787 = vmatmul.f32.vlgmr.msra.gmra.mxu1 %v1662_v32  ;;  %v1663_v33 = vsub.f32 %v1661_v31, %v1662_v32 }
 0x47c   :  { %v1664_v34 = vand.u32 4294901760, %v1663_v33 }
 0x47e   :  { %1665 = vmatmul.f32.vlgmr.msrb.gmra.mxu2 %v1664_v34  ;;  %1857 = vmatmul.f32.vlgmr.msra.gmra.mxu3 %v1660_v30 }
 0x486   :  { %1829 = vmatmul.f32.vlgmr.msra.gmra.mxu2 %v1660_v30 }
 0x4f5   :  { %v1758_v40 = vpop.f32.mrf.mxu0 }
 0x4f7   :  { %v1788_v42 = vpop.f32.mrf.mxu1 }
 0x4f9   :  { %v1722_v36 = vpop.f32.mrf.mxu3 }
 0x501   :  { %v1666_v37 = vpop.f32.mrf.mxu2  ;;  %v1858_v46 = vpop.f32.mrf.mxu3 }
 0x502   :  { %v1667_v38 = vadd.f32 %v1879_v35, %v1666_v37 }
 0x504   :  { %v1723_v39 = vadd.f32 %v1722_v36, %v1667_v38 }
 0x506   :  { %v1759_v41 = vadd.f32 %v1758_v40, %v1723_v39 }
 0x508   :  { %v1789_v43 = vadd.f32 %v1788_v42, %v1759_v41 }
 0x509   :  { %v1830_v44 = vpop.f32.mrf.mxu2 }
 0x50a   :  { %v1831_v45 = vadd.f32 %v1830_v44, %v1789_v43 }
 0x50c   :  { %v1859_v47 = vadd.f32 %v1858_v46, %v1831_v45 }
 0x50e   :  { %1861 = vst.msk [vmem:[%s2312_s17] sm:$0xff] %vm94_vm1, %v1859_v47 }
 0x50f   :  { %1866 = vsyncpa [#allocation3], 1 }
 0x510   :  { %1867 = vsyncpa [#allocation5], 1 }

</bundles_post_ra>
